<compile_context>
chip_gen: v7x
topology: tpu7x:2x2x1
jax: 0.10.0
libtpu: 0.0.40
codegen_flags: <defaults>
</compile_context>

<pallas_src>
import math
import functools

import jax
import jax.numpy as jnp
from jax.experimental import pallas as pl
from jax.experimental.pallas import tpu as pltpu

_LANE = 128
_NEG_INF = -1e30


# ----------------------------- Pallas kernel -----------------------------

def rainbow_kernel(x_ref, w1_ref, b1_ref, w2_ref, b2_ref,
                   wl_ref, bl_ref, s_ref, out_ref, *, n_actions):
    # fc1 -> ReLU
    h1 = jnp.dot(x_ref[...], w1_ref[...], preferred_element_type=jnp.float32) + b1_ref[...]
    h1 = jnp.maximum(h1, 0.0)
    # fc2 -> ReLU
    h2 = jnp.dot(h1, w2_ref[...], preferred_element_type=jnp.float32) + b2_ref[...]
    h2 = jnp.maximum(h2, 0.0)

    # Folded dueling logits: [TB, n_actions * 128] (atoms lane-padded to 128;
    # padded lanes carry bias -1e30 -> exp() == 0 below).
    logits = jnp.dot(h2, wl_ref[...], preferred_element_type=jnp.float32) + bl_ref[...]

    # Stable softmax numerators per action; each 128-wide block is exactly one
    # lane tile, so slices / max / exp are fully vreg-aligned.  n_actions is a
    # small compile-time constant, so this unrolls cleanly.
    p_parts = []
    for a in range(n_actions):
        la = logits[:, a * _LANE:(a + 1) * _LANE]
        m = jnp.max(la, axis=-1, keepdims=True)
        p_parts.append(jnp.exp(la - m))
    p_all = jnp.concatenate(p_parts, axis=-1)                            # [TB, A*128]

    # One MXU matmul replaces 2*n_actions cross-lane reductions.
    # Output lane c:
    #   cols [0,128):   num[c] = sum_j p[c-block, j] * support[j]   (0 for c >= A)
    #   cols [128,256): z[c]   = sum_j p[(c % A)-block, j]          (> 0 everywhere)
    zn = jnp.dot(p_all, s_ref[...], preferred_element_type=jnp.float32)  # [TB, 256]
    num_full = zn[:, :_LANE]
    z_full = zn[:, _LANE:]

    # Lane-dense [TB, 128] unmasked store; lanes >= n_actions are exactly 0.
    out_ref[...] = num_full * pl.reciprocal(z_full, approx=True)


def _round_up(x, m):
    return (x + m - 1) // m * m


def rainbow_forward(x, kparams, *, n_actions, block_b=256):
    """x: [B, F] float32.  Returns q-values [B, n_actions]."""
    B, F = x.shape
    H = kparams["w1"].shape[1]
    AL = kparams["w_logits"].shape[1]        # n_actions * 128

    # Pad batch to a sublane-aligned tile; tile the grid over the batch.
    TB = min(block_b, _round_up(B, 8))
    B_pad = _round_up(B, TB)
    if B_pad != B:
        x = jnp.pad(x, ((0, B_pad - B), (0, 0)))

    kernel = functools.partial(rainbow_kernel, n_actions=n_actions)
    out = pl.pallas_call(
        kernel,
        out_shape=jax.ShapeDtypeStruct((B_pad, _LANE), jnp.float32),
        grid_spec=pltpu.PrefetchScalarGridSpec(
            num_scalar_prefetch=0,
            grid=(B_pad // TB,),
            in_specs=[
                pl.BlockSpec((TB, F), lambda i: (i, 0)),          # x tile (pipelined)
                pl.BlockSpec((F, H), lambda i: (0, 0)),           # w1 (resident)
                pl.BlockSpec((1, H), lambda i: (0, 0)),           # b1
                pl.BlockSpec((H, H), lambda i: (0, 0)),           # w2
                pl.BlockSpec((1, H), lambda i: (0, 0)),           # b2
                pl.BlockSpec((H, AL), lambda i: (0, 0)),          # folded logits weight
                pl.BlockSpec((1, AL), lambda i: (0, 0)),          # folded logits bias
                pl.BlockSpec((AL, 2 * _LANE), lambda i: (0, 0)),  # S (support / mask)
            ],
            out_specs=pl.BlockSpec((TB, _LANE), lambda i: (i, 0)),
        ),
        compiler_params=pltpu.CompilerParams(dimension_semantics=("parallel",)),
    )(x,
      kparams["w1"], kparams["b1"],
      kparams["w2"], kparams["b2"],
      kparams["w_logits"], kparams["b_logits"],
      kparams["S"])
    return out[:B, :n_actions]


# ----------------- deterministic parameter construction -----------------

def _uniform(key, shape, lo, hi):
    return jax.random.uniform(key, shape, jnp.float32, lo, hi)


def _scale_noise(key, size):
    eps = jax.random.normal(key, (size,), jnp.float32)
    return jnp.sign(eps) * jnp.sqrt(jnp.abs(eps))


def make_noisy_linear(key, in_features, out_features, std_init=0.5):
    """Effective (weight [out,in], bias [out]) of NoisyLinear in training mode."""
    k_mu_w, k_mu_b, k_eps_in, k_eps_out = jax.random.split(key, 4)
    mu_range = 1.0 / math.sqrt(in_features)
    weight_mu = _uniform(k_mu_w, (out_features, in_features), -mu_range, mu_range)
    bias_mu = _uniform(k_mu_b, (out_features,), -mu_range, mu_range)
    weight_sigma = jnp.full((out_features, in_features), std_init * mu_range, jnp.float32)
    bias_sigma = jnp.full((out_features,), std_init * mu_range, jnp.float32)
    eps_in = _scale_noise(k_eps_in, in_features)
    eps_out = _scale_noise(k_eps_out, out_features)
    weight = weight_mu + weight_sigma * jnp.outer(eps_out, eps_in)
    bias = bias_mu + bias_sigma * eps_out
    return weight, bias


def make_linear(key, in_features, out_features):
    """PyTorch nn.Linear default init: U(-1/sqrt(in), 1/sqrt(in)) for W and b."""
    k_w, k_b = jax.random.split(key)
    bound = 1.0 / math.sqrt(in_features)
    w = _uniform(k_w, (out_features, in_features), -bound, bound)
    b = _uniform(k_b, (out_features,), -bound, bound)
    return w, b


def make_rainbow_params(key, n_features, n_actions, n_neurons=16, n_atoms=51,
                        v_min=-10.0, v_max=10.0):
    """Raw (un-folded) parameters; weights pre-transposed to [in, out]."""
    k1, k2, k3, k4 = jax.random.split(key, 4)
    w1, b1 = make_linear(k1, n_features, n_neurons)
    w2, b2 = make_linear(k2, n_neurons, n_neurons)
    wv, bv = make_noisy_linear(k3, n_neurons, n_atoms)
    wa, ba = make_noisy_linear(k4, n_neurons, n_actions * n_atoms)
    support = jnp.linspace(v_min, v_max, n_atoms, dtype=jnp.float32)
    return {
        "w1": w1.T, "b1": b1[None, :],
        "w2": w2.T, "b2": b2[None, :],
        "wv": wv.T, "bv": bv[None, :],
        "wa": wa.T, "ba": ba[None, :],
        "support": support[None, :],
    }


def prepare_kernel_params(params, *, n_actions, n_atoms):
    """Fold dueling combine into one lane-padded logits matmul and build S."""
    assert n_atoms <= _LANE, "per-action atom block must fit in one lane tile"
    assert n_actions <= _LANE, "output slab is one lane tile wide"
    H = params["w2"].shape[1]
    pad = _LANE - n_atoms

    wvT = params["wv"]                                      # [H, n_atoms]
    waT = params["wa"].reshape(H, n_actions, n_atoms)       # [H, A, n_atoms]
    bv = params["bv"][0]                                    # [n_atoms]
    ba = params["ba"][0].reshape(n_actions, n_atoms)        # [A, n_atoms]

    # logits[b, a, j] = value[b, j] + adv[b, a, j] - mean_a' adv[b, a', j]
    w_core = wvT[:, None, :] + waT - waT.mean(axis=1, keepdims=True)   # [H, A, n_atoms]
    b_core = bv[None, :] + ba - ba.mean(axis=0, keepdims=True)         # [A, n_atoms]
    w_logits = jnp.pad(w_core, ((0, 0), (0, 0), (0, pad))).reshape(H, n_actions * _LANE)
    b_logits = jnp.pad(b_core, ((0, 0), (0, pad)),
                       constant_values=_NEG_INF).reshape(1, n_actions * _LANE)

    # S: [A*128, 256].  First 128 columns give the expectation numerators,
    # last 128 columns give the softmax denominators (duplicated per lane so
    # that z > 0 everywhere and the output store stays fully lane-dense).
    support = params["support"][0]
    support_pad = jnp.pad(support, (0, pad))                          # [128]
    atom_mask = (jnp.arange(_LANE) < n_atoms).astype(jnp.float32)     # [128]
    row_action = jnp.repeat(jnp.arange(n_actions), _LANE)             # [A*128]
    col = jnp.arange(_LANE)
    num_cols = (row_action[:, None] == col[None, :]).astype(jnp.float32) \
        * jnp.tile(support_pad, n_actions)[:, None]
    z_cols = (row_action[:, None] == (col[None, :] % n_actions)).astype(jnp.float32) \
        * jnp.tile(atom_mask, n_actions)[:, None]
    S = jnp.concatenate([num_cols, z_cols], axis=1)                   # [A*128, 256]

    return {
        "w1": params["w1"], "b1": params["b1"],
        "w2": params["w2"], "b2": params["b2"],
        "w_logits": w_logits, "b_logits": b_logits, "S": S,
    }


# ----------------- pure-JAX reference (for correctness check) -----------------

def rainbow_reference(x, params, *, n_actions, n_atoms):
    h1 = jax.nn.relu(x @ params["w1"] + params["b1"])
    h2 = jax.nn.relu(h1 @ params["w2"] + params["b2"])
    value = (h2 @ params["wv"] + params["bv"]).reshape(-1, 1, n_atoms)
    adv = (h2 @ params["wa"] + params["ba"]).reshape(-1, n_actions, n_atoms)
    logits = value + (adv - adv.mean(axis=1, keepdims=True))
    dist = jax.nn.softmax(logits, axis=2)
    return jnp.sum(params["support"][0] * dist, axis=2)


if __name__ == "__main__":
    n_features, n_actions, n_neurons, n_atoms = 8, 4, 16, 51
    batch = 2

    key = jax.random.PRNGKey(0)
    k_params, k_x = jax.random.split(key)
    params = make_rainbow_params(k_params, n_features, n_actions,
                                 n_neurons=n_neurons, n_atoms=n_atoms)
    kparams = prepare_kernel_params(params, n_actions=n_actions, n_atoms=n_atoms)
    x = jax.random.normal(k_x, (batch, n_features), jnp.float32)

    q = rainbow_forward(x, kparams, n_actions=n_actions)
    q = jax.block_until_ready(q)

    q_ref = rainbow_reference(x, params, n_actions=n_actions, n_atoms=n_atoms)
    assert q.shape == (batch, n_actions), q.shape
    # Tolerance slightly relaxed vs 1e-4: the folded dueling weights reorder fp
    # ops and pl.reciprocal(approx=True) is a lower-precision EUP path.
    assert jnp.allclose(q, q_ref, atol=1e-3, rtol=1e-3), (q, q_ref)

    print("KERNEL_OK")
</pallas_src>

<mosaic_0001>
module attributes {stable_mosaic.version = 11 : i64} {
  func.func @rainbow_kernel(%arg0: i32, %arg1: memref<8x8xf32, #tpu.memory_space<vmem>>, %arg2: memref<8x16xf32, #tpu.memory_space<vmem>>, %arg3: memref<1x16xf32, #tpu.memory_space<vmem>>, %arg4: memref<16x16xf32, #tpu.memory_space<vmem>>, %arg5: memref<1x16xf32, #tpu.memory_space<vmem>>, %arg6: memref<16x512xf32, #tpu.memory_space<vmem>>, %arg7: memref<1x512xf32, #tpu.memory_space<vmem>>, %arg8: memref<512x256xf32, #tpu.memory_space<vmem>>, %arg9: memref<8x128xf32, #tpu.memory_space<vmem>>) attributes {dimension_semantics = [#tpu.dimension_semantics<parallel>], iteration_bounds = array<i64: 1>, scalar_prefetch = 0 : i64, scratch_operands = 0 : i64, tpu.core_type = #tpu.core_type<tc>, window_params = [{transform_indices = @transform_0, window_bounds = array<i64: 8, 8>}, {pipeline_mode = #tpu.pipeline_mode<synchronous>, transform_indices = @transform_1, window_bounds = array<i64: 8, 16>}, {pipeline_mode = #tpu.pipeline_mode<synchronous>, transform_indices = @transform_2, window_bounds = array<i64: 1, 16>}, {pipeline_mode = #tpu.pipeline_mode<synchronous>, transform_indices = @transform_3, window_bounds = array<i64: 16, 16>}, {pipeline_mode = #tpu.pipeline_mode<synchronous>, transform_indices = @transform_4, window_bounds = array<i64: 1, 16>}, {pipeline_mode = #tpu.pipeline_mode<synchronous>, transform_indices = @transform_5, window_bounds = array<i64: 16, 512>}, {pipeline_mode = #tpu.pipeline_mode<synchronous>, transform_indices = @transform_6, window_bounds = array<i64: 1, 512>}, {pipeline_mode = #tpu.pipeline_mode<synchronous>, transform_indices = @transform_7, window_bounds = array<i64: 512, 256>}, {transform_indices = @transform_8, window_bounds = array<i64: 8, 128>}]} {
    %c0 = arith.constant 0 : index
    %c0_0 = arith.constant 0 : index
    %0 = vector.load %arg1[%c0, %c0_0] : memref<8x8xf32, #tpu.memory_space<vmem>>, vector<8x8xf32>
    %c0_1 = arith.constant 0 : index
    %c0_2 = arith.constant 0 : index
    %1 = vector.load %arg2[%c0_1, %c0_2] : memref<8x16xf32, #tpu.memory_space<vmem>>, vector<8x16xf32>
    %cst = arith.constant dense<0.000000e+00> : vector<8x16xf32>
    %2 = tpu.matmul %0, %1, %cst {dimension_numbers = #tpu.dot_dimension_numbers<[1], [0], [0], [1], [0, 0, 1, 1], [], []>} : vector<8x8xf32>, vector<8x16xf32>, vector<8x16xf32> -> vector<8x16xf32>
    %c0_3 = arith.constant 0 : index
    %c0_4 = arith.constant 0 : index
    %3 = vector.load %arg3[%c0_3, %c0_4] : memref<1x16xf32, #tpu.memory_space<vmem>>, vector<1x16xf32>
    %4 = vector.broadcast %3 : vector<1x16xf32> to vector<8x16xf32>
    %5 = arith.addf %2, %4 : vector<8x16xf32>
    %cst_5 = arith.constant 0.000000e+00 : f32
    %6 = vector.broadcast %cst_5 : f32 to vector<8x16xf32>
    %7 = arith.maximumf %5, %6 : vector<8x16xf32>
    %c0_6 = arith.constant 0 : index
    %c0_7 = arith.constant 0 : index
    %8 = vector.load %arg4[%c0_6, %c0_7] : memref<16x16xf32, #tpu.memory_space<vmem>>, vector<16x16xf32>
    %cst_8 = arith.constant dense<0.000000e+00> : vector<8x16xf32>
    %9 = tpu.matmul %7, %8, %cst_8 {dimension_numbers = #tpu.dot_dimension_numbers<[1], [0], [0], [1], [0, 0, 1, 1], [], []>} : vector<8x16xf32>, vector<16x16xf32>, vector<8x16xf32> -> vector<8x16xf32>
    %c0_9 = arith.constant 0 : index
    %c0_10 = arith.constant 0 : index
    %10 = vector.load %arg5[%c0_9, %c0_10] : memref<1x16xf32, #tpu.memory_space<vmem>>, vector<1x16xf32>
    %11 = vector.broadcast %10 : vector<1x16xf32> to vector<8x16xf32>
    %12 = arith.addf %9, %11 : vector<8x16xf32>
    %cst_11 = arith.constant 0.000000e+00 : f32
    %13 = vector.broadcast %cst_11 : f32 to vector<8x16xf32>
    %14 = arith.maximumf %12, %13 : vector<8x16xf32>
    %c0_12 = arith.constant 0 : index
    %c0_13 = arith.constant 0 : index
    %15 = vector.load %arg6[%c0_12, %c0_13] : memref<16x512xf32, #tpu.memory_space<vmem>>, vector<16x512xf32>
    %cst_14 = arith.constant dense<0.000000e+00> : vector<8x512xf32>
    %16 = tpu.matmul %14, %15, %cst_14 {dimension_numbers = #tpu.dot_dimension_numbers<[1], [0], [0], [1], [0, 0, 1, 1], [], []>} : vector<8x16xf32>, vector<16x512xf32>, vector<8x512xf32> -> vector<8x512xf32>
    %c0_15 = arith.constant 0 : index
    %c0_16 = arith.constant 0 : index
    %17 = vector.load %arg7[%c0_15, %c0_16] : memref<1x512xf32, #tpu.memory_space<vmem>>, vector<1x512xf32>
    %18 = vector.broadcast %17 : vector<1x512xf32> to vector<8x512xf32>
    %19 = arith.addf %16, %18 : vector<8x512xf32>
    %20 = vector.extract_strided_slice %19 {offsets = [0, 0], sizes = [8, 128], strides = [1, 1]} : vector<8x512xf32> to vector<8x128xf32>
    %cst_17 = arith.constant dense<0xFF800000> : vector<8xf32>
    %21 = vector.multi_reduction <maximumf>, %20, %cst_17 [1] : vector<8x128xf32> to vector<8xf32>
    %22 = vector.shape_cast %21 : vector<8xf32> to vector<8x1xf32>
    %23 = vector.broadcast %22 : vector<8x1xf32> to vector<8x128xf32>
    %24 = arith.subf %20, %23 : vector<8x128xf32>
    %25 = math.exp %24 : vector<8x128xf32>
    %26 = vector.extract_strided_slice %19 {offsets = [0, 128], sizes = [8, 128], strides = [1, 1]} : vector<8x512xf32> to vector<8x128xf32>
    %cst_18 = arith.constant dense<0xFF800000> : vector<8xf32>
    %27 = vector.multi_reduction <maximumf>, %26, %cst_18 [1] : vector<8x128xf32> to vector<8xf32>
    %28 = vector.shape_cast %27 : vector<8xf32> to vector<8x1xf32>
    %29 = vector.broadcast %28 : vector<8x1xf32> to vector<8x128xf32>
    %30 = arith.subf %26, %29 : vector<8x128xf32>
    %31 = math.exp %30 : vector<8x128xf32>
    %32 = vector.extract_strided_slice %19 {offsets = [0, 256], sizes = [8, 128], strides = [1, 1]} : vector<8x512xf32> to vector<8x128xf32>
    %cst_19 = arith.constant dense<0xFF800000> : vector<8xf32>
    %33 = vector.multi_reduction <maximumf>, %32, %cst_19 [1] : vector<8x128xf32> to vector<8xf32>
    %34 = vector.shape_cast %33 : vector<8xf32> to vector<8x1xf32>
    %35 = vector.broadcast %34 : vector<8x1xf32> to vector<8x128xf32>
    %36 = arith.subf %32, %35 : vector<8x128xf32>
    %37 = math.exp %36 : vector<8x128xf32>
    %38 = vector.extract_strided_slice %19 {offsets = [0, 384], sizes = [8, 128], strides = [1, 1]} : vector<8x512xf32> to vector<8x128xf32>
    %cst_20 = arith.constant dense<0xFF800000> : vector<8xf32>
    %39 = vector.multi_reduction <maximumf>, %38, %cst_20 [1] : vector<8x128xf32> to vector<8xf32>
    %40 = vector.shape_cast %39 : vector<8xf32> to vector<8x1xf32>
    %41 = vector.broadcast %40 : vector<8x1xf32> to vector<8x128xf32>
    %42 = arith.subf %38, %41 : vector<8x128xf32>
    %43 = math.exp %42 : vector<8x128xf32>
    %44 = tpu.concatenate %25, %31, %37, %43 in 1 : vector<8x128xf32>, vector<8x128xf32>, vector<8x128xf32>, vector<8x128xf32> -> vector<8x512xf32>
    %c0_21 = arith.constant 0 : index
    %c0_22 = arith.constant 0 : index
    %45 = vector.load %arg8[%c0_21, %c0_22] : memref<512x256xf32, #tpu.memory_space<vmem>>, vector<512x256xf32>
    %cst_23 = arith.constant dense<0.000000e+00> : vector<8x256xf32>
    %46 = tpu.matmul %44, %45, %cst_23 {dimension_numbers = #tpu.dot_dimension_numbers<[1], [0], [0], [1], [0, 0, 1, 1], [], []>} : vector<8x512xf32>, vector<512x256xf32>, vector<8x256xf32> -> vector<8x256xf32>
    %47 = vector.extract_strided_slice %46 {offsets = [0, 0], sizes = [8, 128], strides = [1, 1]} : vector<8x256xf32> to vector<8x128xf32>
    %48 = vector.extract_strided_slice %46 {offsets = [0, 128], sizes = [8, 128], strides = [1, 1]} : vector<8x256xf32> to vector<8x128xf32>
    %49 = tpu.reciprocal %48 {approx = true} : vector<8x128xf32> -> vector<8x128xf32>
    %50 = arith.mulf %47, %49 : vector<8x128xf32>
    %c0_24 = arith.constant 0 : index
    %c0_25 = arith.constant 0 : index
    %51 = vector.load %arg9[%c0_24, %c0_25] : memref<8x128xf32, #tpu.memory_space<vmem>>, vector<8x128xf32>
    tpu.vector_store %arg9[%c0_24, %c0_25], %50 {strides = array<i32>} : memref<8x128xf32, #tpu.memory_space<vmem>>, vector<8x128xf32>,
    return
  }
  func.func @transform_0(%arg0: i32) -> (i32, i32) {
    %c0_i32 = arith.constant 0 : i32
    %c0_i32_0 = arith.constant 0 : i32
    return %arg0, %c0_i32 : i32, i32
  }
  func.func @transform_1(%arg0: i32) -> (i32, i32) {
    %c0_i32 = arith.constant 0 : i32
    %c0_i32_0 = arith.constant 0 : i32
    %c0_i32_1 = arith.constant 0 : i32
    return %c0_i32, %c0_i32_0 : i32, i32
  }
  func.func @transform_2(%arg0: i32) -> (i32, i32) {
    %c0_i32 = arith.constant 0 : i32
    %c0_i32_0 = arith.constant 0 : i32
    %c0_i32_1 = arith.constant 0 : i32
    return %c0_i32, %c0_i32_0 : i32, i32
  }
  func.func @transform_3(%arg0: i32) -> (i32, i32) {
    %c0_i32 = arith.constant 0 : i32
    %c0_i32_0 = arith.constant 0 : i32
    %c0_i32_1 = arith.constant 0 : i32
    return %c0_i32, %c0_i32_0 : i32, i32
  }
  func.func @transform_4(%arg0: i32) -> (i32, i32) {
    %c0_i32 = arith.constant 0 : i32
    %c0_i32_0 = arith.constant 0 : i32
    %c0_i32_1 = arith.constant 0 : i32
    return %c0_i32, %c0_i32_0 : i32, i32
  }
  func.func @transform_5(%arg0: i32) -> (i32, i32) {
    %c0_i32 = arith.constant 0 : i32
    %c0_i32_0 = arith.constant 0 : i32
    %c0_i32_1 = arith.constant 0 : i32
    return %c0_i32, %c0_i32_0 : i32, i32
  }
  func.func @transform_6(%arg0: i32) -> (i32, i32) {
    %c0_i32 = arith.constant 0 : i32
    %c0_i32_0 = arith.constant 0 : i32
    %c0_i32_1 = arith.constant 0 : i32
    return %c0_i32, %c0_i32_0 : i32, i32
  }
  func.func @transform_7(%arg0: i32) -> (i32, i32) {
    %c0_i32 = arith.constant 0 : i32
    %c0_i32_0 = arith.constant 0 : i32
    %c0_i32_1 = arith.constant 0 : i32
    return %c0_i32, %c0_i32_0 : i32, i32
  }
  func.func @transform_8(%arg0: i32) -> (i32, i32) {
    %c0_i32 = arith.constant 0 : i32
    %c0_i32_0 = arith.constant 0 : i32
    return %arg0, %c0_i32 : i32, i32
  }
}

</mosaic_0001>

<bundles_post_ra>
// kernel: tpu_custom_call.1
= control target key start
LH: loop header
LB: loop body
LE: loop exit
PB: predicated region body
PF: predicated region fallthrough
CT: control target
= control target key end

     0   :  { %13 = vsyncpa [#allocation3], 0  ;;  %s1250_s0 = inlined_call_operand.hbm [shape: f32[8,8], index: 0, kind: input, shape index: {}]   ;;  %s1251_s1 = inlined_call_operand.hbm [shape: f32[8,16], index: 1, kind: input, shape index: {}]   ;;  %s1252_s2 = inlined_call_operand.vmem [shape: f32[1,16], index: 2, kind: input, shape index: {}]   ;;  %s1253_s3 = inlined_call_operand.hbm [shape: f32[16,16], index: 3, kind: input, shape index: {}]   ;;  %s1254_s4 = inlined_call_operand.vmem [shape: f32[1,16], index: 4, kind: input, shape index: {}]   ;;  %s1255_s5 = inlined_call_operand.hbm [shape: f32[16,512], index: 5, kind: input, shape index: {}]   ;;  %s1256_s6 = inlined_call_operand.vmem [shape: f32[1,512], index: 6, kind: input, shape index: {}]   ;;  %s1257_s7 = inlined_call_operand.hbm [shape: f32[512,256], index: 7, kind: input, shape index: {}]   ;;  %s1258_s8 = inlined_call_operand.hbm [shape: f32[8,128], index: 8, kind: output, shape index: {}]  }
   0x1   :  { %14 = vsyncpa [#allocation6], 0 }
   0x2   :  { %15 = vsyncpa [#allocation9], 0 }
   0x3   :  { %16 = vsyncpa [#allocation4], 0  ;;  %s1076_s27 = smov [#allocation5]   ;;  %s1077_s29 = smov [#allocation8]  }
   0x4   :  { %s33_s28 = sshll.u32 %s1076_s27, 4  ;;  %s58_s30 = sshll.u32 %s1077_s29, 4  ;;  %s34_s28 = int_to_ptr.vmem [resolvable:$true] %s33_s28  ;;  %s1136_s30 = int_to_ptr.vmem [resolvable:$true] %s58_s30 }
   0x5   :  { %s936_s11 = scalar_lea.hbm %s1251_s1, 128 }
   0x6   :  { %p937_p0 = scmp.ne.s32.totalorder %s1251_s1, %s936_s11  ;;  %p940_p1 = scmp.lt.u32.totalorder %s936_s11, %s1251_s1 }
   0x8   :  { %p942_p2 = pnand %p940_p1, %p937_p0 }
   0xa   :  { %945 = shalt.err (!%p942_p2)
}
   0xb   :  { %s946_s16 = scalar_lea.vmem %s34_s28, 128  ;;  %p951_p4 = scmp.lt.s32.totalorder %s34_s28, %s34_s28 }
   0xc   :  { %p947_p3 = scmp.ne.s32.totalorder %s34_s28, %s946_s16  ;;  %p952_p5 = scmp.lt.s32.totalorder %s946_s16, %s946_s16 }
   0xe   :  { %p953_p6 = por %p952_p5, %p951_p4 }
  0x10   :  { %p954_p7 = pnand %p953_p6, %p947_p3 }
  0x12   :  { %957 = shalt.err (!%p954_p7)
}
  0x13   :  { %36 = dma.hbm_to_vmem [thread:$0]  %s1251_s1, 128, %s34_s28, [#allocation6]  }
  0x14   :  { %s958_s21 = scalar_lea.hbm %s1255_s5, 1024 }
  0x15   :  { %p959_p8 = scmp.ne.s32.totalorder %s1255_s5, %s958_s21  ;;  %p962_p9 = scmp.lt.u32.totalorder %s958_s21, %s1255_s5 }
  0x17   :  { %p964_p10 = pnand %p962_p9, %p959_p8 }
  0x19   :  { %967 = shalt.err (!%p964_p10)
}
  0x1a   :  { %s968_s26 = scalar_lea.vmem %s1136_s30, 1024  ;;  %p973_p12 = scmp.lt.s32.totalorder %s1136_s30, %s1136_s30 }
  0x1b   :  { %p969_p11 = scmp.ne.s32.totalorder %s1136_s30, %s968_s26  ;;  %p974_p13 = scmp.lt.s32.totalorder %s968_s26, %s968_s26 }
  0x1d   :  { %p975_p0 = por %p974_p13, %p973_p12 }
  0x1f   :  { %p976_p1 = pnand %p975_p0, %p969_p11 }
  0x21   :  { %979 = shalt.err (!%p976_p1)
}
  0x22   :  { %s1078_s1 = smov 512   ;;  %s1079_s27 = smov 32  }
  0x23   :  { %64 = dma.hbm_to_vmem [thread:$0]  %s1255_s5, 1024, %s1136_s30, [#allocation9], %s1078_s1, %s1078_s1, %s1079_s27  }
  0x24   :  { %s1080_s9 = smov [#allocation2]   ;;  %s1081_s11 = smov [#allocation7]  }
  0x25   :  { %s23_s10 = sshll.u32 %s1080_s9, 4  ;;  %s44_s12 = sshll.u32 %s1081_s11, 4  ;;  %s24_s10 = int_to_ptr.vmem [resolvable:$true] %s23_s10  ;;  %s1167_s12 = int_to_ptr.vmem [resolvable:$true] %s44_s12 }
  0x26   :  { %s980_s15 = scalar_lea.hbm %s1250_s0, 128 }
  0x27   :  { %p981_p2 = scmp.ne.s32.totalorder %s1250_s0, %s980_s15  ;;  %p984_p3 = scmp.lt.u32.totalorder %s980_s15, %s1250_s0 }
  0x29   :  { %p986_p4 = pnand %p984_p3, %p981_p2 }
  0x2b   :  { %989 = shalt.err (!%p986_p4)
}
  0x2c   :  { %s990_s5 = scalar_lea.vmem %s24_s10, 128  ;;  %p995_p6 = scmp.lt.s32.totalorder %s24_s10, %s24_s10 }
  0x2d   :  { %p991_p5 = scmp.ne.s32.totalorder %s24_s10, %s990_s5  ;;  %p996_p7 = scmp.lt.s32.totalorder %s990_s5, %s990_s5 }
  0x2f   :  { %p997_p8 = por %p996_p7, %p995_p6 }
  0x31   :  { %p998_p9 = pnand %p997_p8, %p991_p5 }
  0x33   :  { %1001 = shalt.err (!%p998_p9)
}
  0x34   :  { %26 = dma.hbm_to_vmem [thread:$0]  %s1250_s0, 128, %s24_s10, [#allocation3]  }
  0x35   :  { %s1002_s23 = scalar_lea.hbm %s1253_s3, 256 }
  0x36   :  { %p1003_p10 = scmp.ne.s32.totalorder %s1253_s3, %s1002_s23  ;;  %p1006_p11 = scmp.lt.u32.totalorder %s1002_s23, %s1253_s3 }
  0x38   :  { %p1008_p12 = pnand %p1006_p11, %p1003_p10 }
  0x3a   :  { %1011 = shalt.err (!%p1008_p12)
}
  0x3b   :  { %s1012_s27 = scalar_lea.vmem %s1167_s12, 256  ;;  %p1017_p0 = scmp.lt.s32.totalorder %s1167_s12, %s1167_s12 }
  0x3c   :  { %p1013_p13 = scmp.ne.s32.totalorder %s1167_s12, %s1012_s27  ;;  %p1018_p1 = scmp.lt.s32.totalorder %s1012_s27, %s1012_s27 }
  0x3e   :  { %p1019_p2 = por %p1018_p1, %p1017_p0 }
  0x40   :  { %p1020_p3 = pnand %p1019_p2, %p1013_p13 }
  0x42   :  { %1023 = shalt.err (!%p1020_p3)
}
  0x43   :  { %s1082_s0 = smov 128   ;;  %s1083_s28 = smov 8  }
  0x44   :  { %50 = dma.hbm_to_vmem [thread:$0]  %s1253_s3, 256, %s1167_s12, [#allocation6], %s1082_s0, %s1082_s0, %s1083_s28  }
  0x45   :  { %s1084_s10 = smov [#allocation10]   ;;  %s1024_s15 = scalar_lea.hbm %s1257_s7, 16384 }
  0x46   :  { %s72_s11 = sshll.u32 %s1084_s10, 4  ;;  %p1025_p4 = scmp.ne.s32.totalorder %s1257_s7, %s1024_s15  ;;  %s73_s11 = int_to_ptr.vmem [resolvable:$true] %s72_s11 }
  0x47   :  { %p1028_p5 = scmp.lt.u32.totalorder %s1024_s15, %s1257_s7 }
  0x49   :  { %p1030_p6 = pnand %p1028_p5, %p1025_p4 }
  0x4b   :  { %1033 = shalt.err (!%p1030_p6)
}
  0x4c   :  { %s1034_s5 = scalar_lea.vmem %s73_s11, 16384  ;;  %p1039_p8 = scmp.lt.s32.totalorder %s73_s11, %s73_s11 }
  0x4d   :  { %p1035_p7 = scmp.ne.s32.totalorder %s73_s11, %s1034_s5  ;;  %p1040_p9 = scmp.lt.s32.totalorder %s1034_s5, %s1034_s5 }
  0x4f   :  { %p1041_p10 = por %p1040_p9, %p1039_p8 }
  0x51   :  { %p1042_p11 = pnand %p1041_p10, %p1035_p7 }
  0x53   :  { %1045 = shalt.err (!%p1042_p11)
}
  0x54   :  { %s1085_s3 = smov 256   ;;  %s1086_s12 = smov 16  }
  0x55   :  { %78 = dma.hbm_to_vmem [thread:$0]  %s1257_s7, 16384, %s73_s11, [#allocation9], %s1085_s3, %s1085_s3, %s1086_s12  }
  0x56   :  { %1068 = dma.done.wait [#allocation3], 128  }
  0x57   :  { %1069 = vsyncadd [#allocation3], 4294967168 }
  0x58   :  { %1070 = dma.done.wait [#allocation6], 384  }
  0x59   :  { %1071 = vsyncadd [#allocation6], 4294966912 }
  0x5a   :  { %1072 = dma.done.wait [#allocation9], 17408  }
  0x5b   :  { %1073 = vsyncadd [#allocation9], 4294949888  ;;  %v1087_v0 = vmov 0.0   ;;  %vm1088_vm0 = vmmov 0   ;;  %vm103_vm1 = vcmask 64512   ;;  %v95_v1 = vld [vmem:[#allocation5] sm:$0xff] }
  0x5c   :  { %758 = vmatprep.subr.mxu0 %v1087_v0  ;;  %760 = vmatprep.mubr.msk.f32.mxu0 %vm1088_vm0, %v1087_v0  ;;  %v94_v2 = vld [vmem:[#allocation2] sm:$0xff]  ;;  %v178_v3 = vld [vmem:[#allocation7] sm:$0xff]  ;;  %v179_v4 = vld [vmem:[#allocation7 + $0x8] sm:$0xff]  ;;  %v1089_v6 = vmov 0.0|0.0   ;;  %vm187_vm2 = vcmask 130048  }
  0x5d   :  { %767 = vmatprep.mubr.msk.f32.mxu1 %vm1088_vm0, %v1087_v0  ;;  %759 = vmatpush3.msra.mxu0 %v95_v1  ;;  %v771_v5 = vpack.c.bf16 %v179_v4, %v178_v3  ;;  %v747_v7 = vld [vmem:[%s1252_s2] ss:$0 sm:$0xff]  ;;  %v263_v12 = vld [vmem:[#allocation8 + $0x8] sm:$0xff]  ;;  %v265_v14 = vld [vmem:[#allocation8 + $0x18] sm:$0xff] }
  0x5e   :  { %761 = vmatmul.mubr.msk.f32.vlgmr.msra.gmra.mrb[0].mxu0 %vm103_vm1, %v94_v2  ;;  %770 = vmatprep.subr.bf16.mxu1 %v1089_v6  ;;  %v267_v13 = vld [vmem:[#allocation8 + $0x28] sm:$0xff]  ;;  %v262_v16 = vld [vmem:[#allocation8] sm:$0xff]  ;;  %v269_v18 = vld [vmem:[#allocation8 + $0x38] sm:$0xff] }
  0x5f   :  { %359 = vmatprep.mubr.f32.mxu0 %v1087_v0  ;;  %772 = vmatpush3.bf16.msra.mxu1 %v771_v5  ;;  %v773_v15 = vpack.c.bf16 %v267_v13, %v263_v12  ;;  %v266_v17 = vld [vmem:[#allocation8 + $0x20] sm:$0xff]  ;;  %v777_v20 = vpack.c.bf16 %v269_v18, %v265_v14  ;;  %v264_v21 = vld [vmem:[#allocation8 + $0x10] sm:$0xff]  ;;  %v458_v29 = vld [vmem:[#allocation10 + $0x8] sm:$0xff] }
  0x60   :  { %v775_v19 = vpack.c.bf16 %v266_v17, %v262_v16  ;;  %v268_v22 = vld [vmem:[#allocation8 + $0x30] sm:$0xff]  ;;  %v749_v24 = vld [vmem:[%s1254_s4] ss:$0 sm:$0xff]  ;;  %v460_v30 = vld [vmem:[#allocation10 + $0x18] sm:$0xff] }
  0x61   :  { %774 = vmatprep.subr.bf16.mxu0 %v773_v15  ;;  %v779_v23 = vpack.c.bf16 %v268_v22, %v264_v21  ;;  %778 = vmatprep.subr.bf16.mxu1 %v777_v20  ;;  %v457_v31 = vld [vmem:[#allocation10] sm:$0xff]  ;;  %v781_v32 = vpack.c.bf16 %v460_v30, %v458_v29  ;;  %v459_v33 = vld [vmem:[#allocation10 + $0x10] sm:$0xff]  ;;  %v462_v34 = vld [vmem:[#allocation10 + $0x28] sm:$0xff] }
  0x62   :  { %776 = vmatpush1.bf16.msra.mxu0 %v775_v19  ;;  %v464_v35 = vld [vmem:[#allocation10 + $0x38] sm:$0xff]  ;;  %v783_v36 = vpack.c.bf16 %v459_v33, %v457_v31  ;;  %v522_v38 = vld [vmem:[#allocation10 + $0x208] sm:$0xff]  ;;  %v461_v40 = vld [vmem:[#allocation10 + $0x20] sm:$0xff] }
  0x63   :  { %v785_v37 = vpack.c.bf16 %v464_v35, %v462_v34  ;;  %v524_v39 = vld [vmem:[#allocation10 + $0x218] sm:$0xff]  ;;  %v463_v42 = vld [vmem:[#allocation10 + $0x30] sm:$0xff]  ;;  %v521_v43 = vld [vmem:[#allocation10 + $0x200] sm:$0xff] }
  0x64   :  { %v845_v41 = vpack.c.bf16 %v524_v39, %v522_v38  ;;  %v523_v44 = vld [vmem:[#allocation10 + $0x210] sm:$0xff]  ;;  %v787_v45 = vpack.c.bf16 %v463_v42, %v461_v40  ;;  %v466_v47 = vld [vmem:[#allocation10 + $0x48] sm:$0xff]  ;;  %v468_v48 = vld [vmem:[#allocation10 + $0x58] sm:$0xff] }
  0x65   :  { %v847_v46 = vpack.c.bf16 %v523_v44, %v521_v43  ;;  %v526_v49 = vld [vmem:[#allocation10 + $0x228] sm:$0xff]  ;;  %v789_v50 = vpack.c.bf16 %v468_v48, %v466_v47  ;;  %v528_v51 = vld [vmem:[#allocation10 + $0x238] sm:$0xff]  ;;  %v465_v52 = vld [vmem:[#allocation10 + $0x40] sm:$0xff] }
  0x66   :  { %846 = vmatprep.subr.bf16.mxu0 %v845_v41  ;;  %v467_v53 = vld [vmem:[#allocation10 + $0x50] sm:$0xff]  ;;  %v849_v54 = vpack.c.bf16 %v528_v51, %v526_v49  ;;  %v525_v55 = vld [vmem:[#allocation10 + $0x220] sm:$0xff]  ;;  %v470_v57 = vld [vmem:[#allocation10 + $0x68] sm:$0xff] }
  0x67   :  { %v527_v56 = vld [vmem:[#allocation10 + $0x230] sm:$0xff]  ;;  %v472_v59 = vld [vmem:[#allocation10 + $0x78] sm:$0xff]  ;;  %v530_v60 = vld [vmem:[#allocation10 + $0x248] sm:$0xff]  ;;  %v791_v62 = vpack.c.bf16 %v467_v53, %v465_v52 }
  0x68   :  { %v851_v58 = vpack.c.bf16 %v527_v56, %v525_v55  ;;  %v532_v61 = vld [vmem:[#allocation10 + $0x258] sm:$0xff]  ;;  %v529_v1 = vld [vmem:[#allocation10 + $0x240] sm:$0xff]  ;;  %v793_v2 = vpack.c.bf16 %v472_v59, %v470_v57  ;;  %v471_v3 = vld [vmem:[#allocation10 + $0x70] sm:$0xff] }
  0x69   :  { %v853_v63 = vpack.c.bf16 %v532_v61, %v530_v60  ;;  %v531_v4 = vld [vmem:[#allocation10 + $0x250] sm:$0xff]  ;;  %v474_v5 = vld [vmem:[#allocation10 + $0x88] sm:$0xff]  ;;  %v473_v16 = vld [vmem:[#allocation10 + $0x80] sm:$0xff] }
  0x6a   :  { %v855_v6 = vpack.c.bf16 %v531_v4, %v529_v1  ;;  %v535_v12 = vld [vmem:[#allocation10 + $0x270] sm:$0xff]  ;;  %v538_v14 = vld [vmem:[#allocation10 + $0x288] sm:$0xff]  ;;  %v540_v18 = vld [vmem:[#allocation10 + $0x298] sm:$0xff] }
  0x6b   :  { %v475_v17 = vld [vmem:[#allocation10 + $0x90] sm:$0xff]  ;;  %v478_v20 = vld [vmem:[#allocation10 + $0xa8] sm:$0xff]  ;;  %v480_v21 = vld [vmem:[#allocation10 + $0xb8] sm:$0xff]  ;;  %v861_v22 = vpack.c.bf16 %v540_v18, %v538_v14 }
  0x6c   :  { %v477_v29 = vld [vmem:[#allocation10 + $0xa0] sm:$0xff]  ;;  %v479_v30 = vld [vmem:[#allocation10 + $0xb0] sm:$0xff]  ;;  %v484_v33 = vld [vmem:[#allocation10 + $0xd8] sm:$0xff] }
  0x6d   :  { %v541_v35 = vld [vmem:[#allocation10 + $0x2a0] sm:$0xff]  ;;  %v546_v38 = vld [vmem:[#allocation10 + $0x2c8] sm:$0xff]  ;;  %v548_v39 = vld [vmem:[#allocation10 + $0x2d8] sm:$0xff] }
  0x6e   :  { %v481_v41 = vld [vmem:[#allocation10 + $0xc0] sm:$0xff]  ;;  %v483_v42 = vld [vmem:[#allocation10 + $0xd0] sm:$0xff]  ;;  %v486_v44 = vld [vmem:[#allocation10 + $0xe8] sm:$0xff] }
  0x6f   :  { %v545_v47 = vld [vmem:[#allocation10 + $0x2c0] sm:$0xff]  ;;  %v547_v48 = vld [vmem:[#allocation10 + $0x2d0] sm:$0xff]  ;;  %v807_v49 = vpack.c.bf16 %v483_v42, %v481_v41  ;;  %v552_v51 = vld [vmem:[#allocation10 + $0x2f8] sm:$0xff] }
  0x70   :  { %v485_v53 = vld [vmem:[#allocation10 + $0xe0] sm:$0xff]  ;;  %v871_v55 = vpack.c.bf16 %v547_v48, %v545_v47  ;;  %v490_v56 = vld [vmem:[#allocation10 + $0x108] sm:$0xff]  ;;  %v492_v57 = vld [vmem:[#allocation10 + $0x118] sm:$0xff] }
  0x71   :  { %v549_v59 = vld [vmem:[#allocation10 + $0x2e0] sm:$0xff]  ;;  %v551_v60 = vld [vmem:[#allocation10 + $0x2f0] sm:$0xff]  ;;  %v494_v4 = vld [vmem:[#allocation10 + $0x128] sm:$0xff] }
  0x72   :  { %v489_v1 = vld [vmem:[#allocation10 + $0x100] sm:$0xff]  ;;  %v495_v14 = vld [vmem:[#allocation10 + $0x130] sm:$0xff] }
  0x73   :  { %v270_v42 = vld [vmem:[%s1256_s6] sm:$0xf]  ;;  %s1090_s6 = smov [#allocation11]  }
  0x74   :  { %s736_s24 = sshll.u32 %s1090_s6, 4  ;;  %s737_s24 = int_to_ptr.vmem [resolvable:$true] %s736_s24 }
  0x75   :  { %s1046_s25 = scalar_lea.vmem %s737_s24, 128  ;;  %p1051_p13 = scmp.lt.s32.totalorder %s737_s24, %s737_s24 }
  0x76   :  { %p1047_p12 = scmp.ne.s32.totalorder %s737_s24, %s1046_s25  ;;  %p1052_p0 = scmp.lt.s32.totalorder %s1046_s25, %s1046_s25 }
  0x78   :  { %p1053_p1 = por %p1052_p0, %p1051_p13 }
  0x7a   :  { %p1054_p2 = pnand %p1053_p1, %p1047_p12 }
 0x131   :  { %v173_v8 = vpop.f32.mrb[0].mxu0 }
 0x132   :  { %v174_v9 = vadd.f32 %v747_v7, %v173_v8  ;;  %v762_v10 = vpop.f32.mrb[1].mxu0  ;;  %v476_v7 = vld [vmem:[#allocation10 + $0x98] sm:$0xff]  ;;  %v534_v8 = vld [vmem:[#allocation10 + $0x268] sm:$0xff] }
 0x133   :  { %v797_v15 = vpack.c.bf16 %v476_v7, %v474_v5  ;;  %v496_v5 = vld [vmem:[#allocation10 + $0x138] sm:$0xff]  ;;  %v553_v7 = vld [vmem:[#allocation10 + $0x300] sm:$0xff] }
 0x134   :  { %v177_v11 = vmax.f32 %v174_v9, 0.0  ;;  %v536_v9 = vld [vmem:[#allocation10 + $0x278] sm:$0xff] }
 0x135   :  { %v857_v10 = vpack.c.bf16 %v536_v9, %v534_v8  ;;  %v555_v8 = vld [vmem:[#allocation10 + $0x310] sm:$0xff] }
 0x136   :  { %768 = vmatmul.mubr.msk.f32.vlgmr.msra.gmra.mrb[0].mxu1 %vm187_vm2, %v177_v11  ;;  %v533_v11 = vld [vmem:[#allocation10 + $0x260] sm:$0xff] }
 0x137   :  { %430 = vmatprep.mubr.f32.mxu1 %v1087_v0  ;;  %780 = vmatpush1.bf16.msra.mxu1 %v779_v23  ;;  %v469_v0 = vld [vmem:[#allocation10 + $0x60] sm:$0xff]  ;;  %v859_v19 = vpack.c.bf16 %v535_v12, %v533_v11  ;;  %v560_v11 = vld [vmem:[#allocation10 + $0x338] sm:$0xff]  ;;  %v817_v12 = vpack.c.bf16 %v496_v5, %v494_v4  ;;  %v567_v4 = vld [vmem:[#allocation10 + $0x370] sm:$0xff] }
 0x138   :  { %782 = vmatprep.subr.bf16.mxu1 %v781_v32  ;;  %v795_v13 = vpack.c.bf16 %v471_v3, %v469_v0  ;;  %v537_v23 = vld [vmem:[#allocation10 + $0x280] sm:$0xff]  ;;  %v482_v32 = vld [vmem:[#allocation10 + $0xc8] sm:$0xff]  ;;  %v813_v0 = vpack.c.bf16 %v492_v57, %v490_v56  ;;  %v875_v3 = vpack.c.bf16 %v551_v60, %v549_v59  ;;  %v508_v59 = vld [vmem:[#allocation10 + $0x198] sm:$0xff] }
 0x139   :  { %v805_v40 = vpack.c.bf16 %v484_v33, %v482_v32  ;;  %v563_v32 = vld [vmem:[#allocation10 + $0x350] sm:$0xff]  ;;  %v566_v60 = vld [vmem:[#allocation10 + $0x368] sm:$0xff] }
 0x209   :  { %v257_v25 = vpop.f32.mrb[0].mxu1 }
 0x20a   :  { %v258_v26 = vadd.f32 %v749_v24, %v257_v25  ;;  %v769_v27 = vpop.f32.mrb[1].mxu1  ;;  %v539_v24 = vld [vmem:[#allocation10 + $0x290] sm:$0xff]  ;;  %v799_v25 = vpack.c.bf16 %v475_v17, %v473_v16  ;;  %v498_v16 = vld [vmem:[#allocation10 + $0x148] sm:$0xff]  ;;  %v500_v17 = vld [vmem:[#allocation10 + $0x158] sm:$0xff] }
 0x20b   :  { %v544_v27 = vld [vmem:[#allocation10 + $0x2b8] sm:$0xff]  ;;  %v863_v31 = vpack.c.bf16 %v539_v24, %v537_v23  ;;  %v821_v24 = vpack.c.bf16 %v500_v17, %v498_v16  ;;  %v571_v16 = vld [vmem:[#allocation10 + $0x390] sm:$0xff] }
 0x20c   :  { %v261_v28 = vmax.f32 %v258_v26, 0.0  ;;  %v542_v26 = vld [vmem:[#allocation10 + $0x2a8] sm:$0xff]  ;;  %v564_v23 = vld [vmem:[#allocation10 + $0x358] sm:$0xff] }
 0x20d   :  { %v865_v34 = vpack.c.bf16 %v544_v27, %v542_v26  ;;  %v499_v26 = vld [vmem:[#allocation10 + $0x150] sm:$0xff] }
 0x20e   :  { %751 = vmatmul.mubr.msk.f32.vlgmr.msra.gmra.mrb[2].mxu0 %vm187_vm2, %v261_v28  ;;  %752 = vmatmul.mubr.msk.f32.vlgmr.msra.gmra.mrb[2].mxu1 %vm187_vm2, %v261_v28  ;;  %v801_v28 = vpack.c.bf16 %v480_v21, %v478_v20  ;;  %v559_v20 = vld [vmem:[#allocation10 + $0x330] sm:$0xff] }
 0x20f   :  { %784 = vmatpush1.bf16.msra.mxu1 %v783_v36  ;;  %848 = vmatpush1.bf16.msra.mxu0 %v847_v46  ;;  %v543_v36 = vld [vmem:[#allocation10 + $0x2b0] sm:$0xff]  ;;  %v869_v46 = vpack.c.bf16 %v548_v39, %v546_v38  ;;  %v272_v39 = vlaneseq }
 0x210   :  { %786 = vmatprep.subr.bf16.mxu1 %v785_v37  ;;  %850 = vmatprep.subr.bf16.mxu0 %v849_v54  ;;  %v803_v37 = vpack.c.bf16 %v479_v30, %v477_v29  ;;  %v867_v43 = vpack.c.bf16 %v543_v36, %v541_v35  ;;  %v487_v54 = vld [vmem:[#allocation10 + $0xf0] sm:$0xff]  ;;  %v504_v29 = vld [vmem:[#allocation10 + $0x178] sm:$0xff]  ;;  %v501_v35 = vld [vmem:[#allocation10 + $0x160] sm:$0xff] }
 0x211   :  { %v811_v61 = vpack.c.bf16 %v487_v54, %v485_v53  ;;  %v503_v36 = vld [vmem:[#allocation10 + $0x170] sm:$0xff] }
 0x212   :  { %v827_v38 = vpack.c.bf16 %v503_v36, %v501_v35  ;;  %v517_v35 = vld [vmem:[#allocation10 + $0x1e0] sm:$0xff]  ;;  %v519_v36 = vld [vmem:[#allocation10 + $0x1f0] sm:$0xff] }
 0x213   :  { %788 = vmatpush1.bf16.msra.mxu1 %v787_v45  ;;  %852 = vmatpush1.bf16.msra.mxu0 %v851_v58  ;;  %v488_v45 = vld [vmem:[#allocation10 + $0xf8] sm:$0xff] }
 0x214   :  { %790 = vmatprep.subr.bf16.mxu1 %v789_v50  ;;  %854 = vmatprep.subr.bf16.mxu0 %v853_v63  ;;  %v550_v50 = vld [vmem:[#allocation10 + $0x2e8] sm:$0xff]  ;;  %v809_v52 = vpack.c.bf16 %v488_v45, %v486_v44  ;;  %v556_v63 = vld [vmem:[#allocation10 + $0x318] sm:$0xff] }
 0x215   :  { %v873_v58 = vpack.c.bf16 %v552_v51, %v550_v50 }
 0x217   :  { %792 = vmatpush1.bf16.msra.mxu1 %v791_v62  ;;  %856 = vmatpush1.bf16.msra.mxu0 %v855_v6  ;;  %v554_v62 = vld [vmem:[#allocation10 + $0x308] sm:$0xff] }
 0x218   :  { %794 = vmatprep.subr.bf16.mxu1 %v793_v2  ;;  %858 = vmatprep.subr.bf16.mxu0 %v857_v10  ;;  %v491_v2 = vld [vmem:[#allocation10 + $0x110] sm:$0xff]  ;;  %v877_v6 = vpack.c.bf16 %v556_v63, %v554_v62  ;;  %v558_v10 = vld [vmem:[#allocation10 + $0x328] sm:$0xff]  ;;  %v568_v62 = vld [vmem:[#allocation10 + $0x378] sm:$0xff] }
 0x219   :  { %v815_v9 = vpack.c.bf16 %v491_v2, %v489_v1  ;;  %v881_v18 = vpack.c.bf16 %v560_v11, %v558_v10  ;;  %v505_v63 = vld [vmem:[#allocation10 + $0x180] sm:$0xff]  ;;  %v889_v1 = vpack.c.bf16 %v568_v62, %v566_v60  ;;  %v572_v10 = vld [vmem:[#allocation10 + $0x398] sm:$0xff] }
 0x21a   :  { %v509_v11 = vld [vmem:[#allocation10 + $0x1a0] sm:$0xff] }
 0x21b   :  { %796 = vmatpush1.bf16.msra.mxu1 %v795_v13  ;;  %860 = vmatpush1.bf16.msra.mxu0 %v859_v19  ;;  %v493_v13 = vld [vmem:[#allocation10 + $0x120] sm:$0xff] }
 0x21c   :  { %798 = vmatprep.subr.bf16.mxu1 %v797_v15  ;;  %862 = vmatprep.subr.bf16.mxu0 %v861_v22  ;;  %v879_v15 = vpack.c.bf16 %v555_v8, %v553_v7  ;;  %v557_v19 = vld [vmem:[#allocation10 + $0x320] sm:$0xff]  ;;  %v819_v21 = vpack.c.bf16 %v495_v14, %v493_v13  ;;  %v562_v22 = vld [vmem:[#allocation10 + $0x348] sm:$0xff]  ;;  %v512_v7 = vld [vmem:[#allocation10 + $0x1b8] sm:$0xff] }
 0x21d   :  { %v883_v27 = vpack.c.bf16 %v559_v20, %v557_v19  ;;  %v885_v30 = vpack.c.bf16 %v564_v23, %v562_v22  ;;  %v570_v8 = vld [vmem:[#allocation10 + $0x388] sm:$0xff]  ;;  %v516_v19 = vld [vmem:[#allocation10 + $0x1d8] sm:$0xff]  ;;  %v513_v23 = vld [vmem:[#allocation10 + $0x1c0] sm:$0xff] }
 0x21e   :  { %v893_v13 = vpack.c.bf16 %v572_v10, %v570_v8  ;;  %v574_v20 = vld [vmem:[#allocation10 + $0x3a8] sm:$0xff]  ;;  %v576_v22 = vld [vmem:[#allocation10 + $0x3b8] sm:$0xff] }
 0x21f   :  { %800 = vmatpush1.bf16.msra.mxu1 %v799_v25  ;;  %864 = vmatpush1.bf16.msra.mxu0 %v863_v31  ;;  %v497_v25 = vld [vmem:[#allocation10 + $0x140] sm:$0xff] }
 0x220   :  { %802 = vmatprep.subr.bf16.mxu1 %v801_v28  ;;  %866 = vmatprep.subr.bf16.mxu0 %v865_v34  ;;  %v502_v28 = vld [vmem:[#allocation10 + $0x168] sm:$0xff]  ;;  %v561_v31 = vld [vmem:[#allocation10 + $0x340] sm:$0xff]  ;;  %v823_v33 = vpack.c.bf16 %v499_v26, %v497_v25  ;;  %v897_v25 = vpack.c.bf16 %v576_v22, %v574_v20 }
 0x221   :  { %v825_v34 = vpack.c.bf16 %v504_v29, %v502_v28  ;;  %v575_v28 = vld [vmem:[#allocation10 + $0x3b0] sm:$0xff] }
 0x223   :  { %804 = vmatpush1.bf16.msra.mxu1 %v803_v37  ;;  %868 = vmatpush1.bf16.msra.mxu0 %v867_v43  ;;  %v887_v37 = vpack.c.bf16 %v563_v32, %v561_v31  ;;  %v520_v31 = vld [vmem:[#allocation10 + $0x1f8] sm:$0xff]  ;;  %v578_v32 = vld [vmem:[#allocation10 + $0x3c8] sm:$0xff] }
 0x224   :  { %806 = vmatprep.subr.bf16.mxu1 %v805_v40  ;;  %870 = vmatprep.subr.bf16.mxu0 %v869_v46  ;;  %v273_v40 = vshrl.u32 %v272_v39, 7  ;;  %v577_v39 = vld [vmem:[#allocation10 + $0x3c0] sm:$0xff] }
 0x226   :  { %v274_v41 = vsub.s32 0, %v273_v40  ;;  %v278_v43 = vsub.s32 1, %v273_v40  ;;  %v282_v45 = vsub.s32 2, %v273_v40  ;;  %v286_v47 = vsub.s32 3, %v273_v40  ;;  %v579_v40 = vld [vmem:[#allocation10 + $0x3d0] sm:$0xff] }
 0x227   :  { %808 = vmatpush1.bf16.msra.mxu1 %v807_v49  ;;  %872 = vmatpush1.bf16.msra.mxu0 %v871_v55 }
 0x228   :  { %810 = vmatprep.subr.bf16.mxu1 %v809_v52  ;;  %874 = vmatprep.subr.bf16.mxu0 %v873_v58  ;;  %v275_v44 = vrot.slane %v270_v42, %v274_v41  ;;  %v279_v46 = vrot.slane %v270_v42, %v278_v43  ;;  %v283_v51 = vrot.slane %v270_v42, %v282_v45  ;;  %v506_v58 = vld [vmem:[#allocation10 + $0x188] sm:$0xff]  ;;  %v584_v43 = vld [vmem:[#allocation10 + $0x3f8] sm:$0xff]  ;;  %v581_v45 = vld [vmem:[#allocation10 + $0x3e0] sm:$0xff] }
 0x229   :  { %v287_v55 = vrot.slane %v270_v42, %v286_v47  ;;  %v903_v41 = vpack.c.bf16 %v579_v40, %v577_v39  ;;  %v582_v42 = vld [vmem:[#allocation10 + $0x3e8] sm:$0xff] }
 0x22b   :  { %812 = vmatpush1.bf16.msra.mxu1 %v811_v61  ;;  %876 = vmatpush1.bf16.msra.mxu0 %v875_v3  ;;  %v829_v61 = vpack.c.bf16 %v508_v59, %v506_v58  ;;  %v565_v3 = vld [vmem:[#allocation10 + $0x360] sm:$0xff] }
 0x22c   :  { %814 = vmatprep.subr.bf16.mxu1 %v813_v0  ;;  %878 = vmatprep.subr.bf16.mxu0 %v877_v6  ;;  %v507_v0 = vld [vmem:[#allocation10 + $0x190] sm:$0xff]  ;;  %v891_v5 = vpack.c.bf16 %v567_v4, %v565_v3  ;;  %v510_v6 = vld [vmem:[#allocation10 + $0x1a8] sm:$0xff] }
 0x22d   :  { %v831_v2 = vpack.c.bf16 %v507_v0, %v505_v63 }
 0x22f   :  { %816 = vmatpush1.bf16.msra.mxu1 %v815_v9  ;;  %880 = vmatpush1.bf16.msra.mxu0 %v879_v15  ;;  %v833_v9 = vpack.c.bf16 %v512_v7, %v510_v6  ;;  %v569_v15 = vld [vmem:[#allocation10 + $0x380] sm:$0xff] }
 0x230   :  { %818 = vmatprep.subr.bf16.mxu1 %v817_v12  ;;  %882 = vmatprep.subr.bf16.mxu0 %v881_v18  ;;  %v511_v12 = vld [vmem:[#allocation10 + $0x1b0] sm:$0xff]  ;;  %v895_v17 = vpack.c.bf16 %v571_v16, %v569_v15  ;;  %v514_v18 = vld [vmem:[#allocation10 + $0x1c8] sm:$0xff] }
 0x231   :  { %v835_v14 = vpack.c.bf16 %v511_v12, %v509_v11 }
 0x233   :  { %820 = vmatpush1.bf16.msra.mxu1 %v819_v21  ;;  %884 = vmatpush1.bf16.msra.mxu0 %v883_v27  ;;  %v837_v21 = vpack.c.bf16 %v516_v19, %v514_v18  ;;  %v573_v27 = vld [vmem:[#allocation10 + $0x3a0] sm:$0xff] }
 0x234   :  { %822 = vmatprep.subr.bf16.mxu1 %v821_v24  ;;  %886 = vmatprep.subr.bf16.mxu0 %v885_v30  ;;  %v515_v24 = vld [vmem:[#allocation10 + $0x1d0] sm:$0xff]  ;;  %v899_v29 = vpack.c.bf16 %v575_v28, %v573_v27  ;;  %v518_v30 = vld [vmem:[#allocation10 + $0x1e8] sm:$0xff] }
 0x235   :  { %v839_v26 = vpack.c.bf16 %v515_v24, %v513_v23 }
 0x237   :  { %824 = vmatpush1.bf16.msra.mxu1 %v823_v33  ;;  %888 = vmatpush1.bf16.msra.mxu0 %v887_v37  ;;  %v841_v33 = vpack.c.bf16 %v520_v31, %v518_v30 }
 0x238   :  { %826 = vmatprep.subr.bf16.mxu1 %v825_v34  ;;  %890 = vmatprep.subr.bf16.mxu0 %v889_v1  ;;  %v580_v34 = vld [vmem:[#allocation10 + $0x3d8] sm:$0xff] }
 0x239   :  { %v901_v37 = vpack.c.bf16 %v580_v34, %v578_v32 }
 0x23b   :  { %828 = vmatpush1.bf16.msra.mxu1 %v827_v38  ;;  %892 = vmatpush1.bf16.msra.mxu0 %v891_v5  ;;  %v843_v38 = vpack.c.bf16 %v519_v36, %v517_v35 }
 0x23c   :  { %830 = vmatprep.subr.bf16.mxu1 %v829_v61  ;;  %894 = vmatprep.subr.bf16.mxu0 %v893_v13 }
 0x23f   :  { %832 = vmatpush1.bf16.msra.mxu1 %v831_v2  ;;  %896 = vmatpush1.bf16.msra.mxu0 %v895_v17 }
 0x240   :  { %834 = vmatprep.subr.bf16.mxu1 %v833_v9  ;;  %898 = vmatprep.subr.bf16.mxu0 %v897_v25 }
 0x243   :  { %836 = vmatpush1.bf16.msra.mxu1 %v835_v14  ;;  %900 = vmatpush1.bf16.msra.mxu0 %v899_v29 }
 0x244   :  { %838 = vmatprep.subr.bf16.mxu1 %v837_v21  ;;  %902 = vmatprep.subr.bf16.mxu0 %v901_v37 }
 0x247   :  { %840 = vmatpush1.bf16.msra.mxu1 %v839_v26  ;;  %904 = vmatpush1.bf16.msra.mxu0 %v903_v41 }
 0x248   :  { %842 = vmatprep.subr.bf16.mxu1 %v841_v33 }
 0x24b   :  { %844 = vmatpush1.bf16.msra.mxu1 %v843_v38 }
 0x2e1   :  { %v361_v48 = vpop.f32.mrb[2].mxu0  ;;  %v432_v49 = vpop.f32.mrb[2].mxu1 }
 0x2e2   :  { %v1222_v50 = vadd.f32 %v361_v48, %v275_v44  ;;  %v363_v52 = vpop.f32.mrb[3].mxu0  ;;  %v434_v53 = vpop.f32.mrb[3].mxu1  ;;  %v1228_v56 = vadd.f32 %v432_v49, %v283_v51  ;;  %v905_v44 = vpack.c.bf16 %v584_v43, %v582_v42 }
 0x2e3   :  { %v1224_v54 = vadd.f32 %v363_v52, %v279_v46  ;;  %v1230_v57 = vadd.f32 %v434_v53, %v287_v55  ;;  %v583_v46 = vld [vmem:[#allocation10 + $0x3f0] sm:$0xff] }
 0x2e4   :  { %437 = vmax.xlane.f32.xlu1 %v1222_v50  ;;  %v907_v47 = vpack.c.bf16 %v583_v46, %v581_v45  ;;  %906 = vmatprep.subr.bf16.mxu0 %v905_v44 }
 0x2e5   :  { %442 = vmax.xlane.f32.xlu0 %v1224_v54 }
 0x2e6   :  { %908 = vmatpush1.bf16.msra.mxu0 %v907_v47 }
 0x2e8   :  { %447 = vmax.xlane.f32.xlu1 %v1228_v56 }
 0x2e9   :  { %452 = vmax.xlane.f32.xlu0 %v1230_v57 }
 0x371   :  { %v438_v48 = vpop.xlane.xlu1 %437 }
 0x372   :  { %v439_v49 = vsub.f32 %v1222_v50, %v438_v48  ;;  %v443_v51 = vpop.xlane.xlu0 %442 }
 0x373   :  { %v444_v52 = vsub.f32 %v1224_v54, %v443_v51 }
 0x374   :  { %v440_v53 = vmul.f32 1.442695, %v439_v49 }
 0x375   :  { %v445_v55 = vmul.f32 1.442695, %v444_v52  ;;  %v448_v58 = vpop.xlane.xlu1 %447 }
 0x376   :  { %v449_v59 = vsub.f32 %v1228_v56, %v448_v58  ;;  %v453_v60 = vpop.xlane.xlu0 %452 }
 0x377   :  { %926 = vpow2.f32 %v445_v55  ;;  %v454_v61 = vsub.f32 %v1230_v57, %v453_v60 }
 0x378   :  { %928 = vpow2.f32 %v440_v53  ;;  %v450_v62 = vmul.f32 1.442695, %v449_v59 }
 0x379   :  { %v455_v63 = vmul.f32 1.442695, %v454_v61 }
 0x37b   :  { %930 = vpow2.f32 %v455_v63 }
 0x37c   :  { %932 = vpow2.f32 %v450_v62 }
 0x381   :  { %v927_v0 = vpop.eup %926 }
 0x382   :  { %v929_v1 = vpop.eup %928  ;;  %649 = vmatprep.mubr.f32.mxu1 %v927_v0 }
 0x383   :  { %650 = vmatmul.mubr.f32.vlgmr.msra.gmra.mrb[4].mxu1 %v929_v1 }
 0x385   :  { %v931_v50 = vpop.eup %930 }
 0x386   :  { %v933_v54 = vpop.eup %932  ;;  %720 = vmatprep.mubr.f32.mxu0 %v931_v50 }
 0x387   :  { %721 = vmatmul.mubr.f32.vlgmr.msra.gmra.mrb[4].mxu0 %v933_v54 }
 0x456   :  { %v651_v2 = vpop.f32.mrb[4].mxu1 }
 0x457   :  { %v653_v3 = vpop.f32.mrb[5].mxu1 }
 0x45a   :  { %v722_v56 = vpop.f32.mrb[4].mxu0 }
 0x45b   :  { %v723_v4 = vadd.f32 %v722_v56, %v651_v2  ;;  %v724_v5 = vpop.f32.mrb[5].mxu0 }
 0x45c   :  { %v725_v6 = vadd.f32 %v724_v5, %v653_v3 }
 0x45e   :  { %934 = vrcp.f32 %v725_v6 }
 0x468   :  { %v935_v57 = vpop.eup %934 }
 0x469   :  { %v728_v7 = vmul.f32 %v935_v57, %v723_v4 }
 0x46b   :  { %729 = vst [vmem:[#allocation11] sm:$0xff] %v728_v7 }
 0x46c   :  { %1057 = shalt.err (!%p1054_p2)
}
 0x46d   :  { %s1058_s27 = scalar_lea.hbm %s1258_s8, 128 }
 0x46e   :  { %p1059_p3 = scmp.ne.s32.totalorder %s1258_s8, %s1058_s27  ;;  %p1062_p4 = scmp.lt.u32.totalorder %s1058_s27, %s1258_s8 }
 0x470   :  { %p1064_p5 = pnand %p1062_p4, %p1059_p3 }
 0x472   :  { %1067 = shalt.err (!%p1064_p5)
}
 0x473   :  { %739 = dma.vmem_to_hbm [thread:$0]  %s737_s24, 128, %s1258_s8, [#allocation4]  }
 0x474   :  { %1074 = dma.done.wait [#allocation4], 128  }
 0x475   :  { %1075 = vsyncadd [#allocation4], 4294967168 }
 0x476   :  { %743 = vsyncpa [#allocation3], 1 }
 0x477   :  { %744 = vsyncpa [#allocation6], 1 }
 0x478   :  { %745 = vsyncpa [#allocation9], 1 }
 0x479   :  { %746 = vsyncpa [#allocation4], 1 }

</bundles_post_ra>
